<compile_context>
chip_gen: v7x
topology: tpu7x:2x2x1
jax: 0.10.0
libtpu: 0.0.40
codegen_flags: <defaults>
</compile_context>

<pallas_src>
import math

import jax
import jax.numpy as jnp
from jax.experimental import pallas as pl
from jax.experimental.pallas import tpu as pltpu

# ---- module hyper-parameters (small, consistent with __init__) ----
S_DIM = 4
OUTPUT_DIM = 4
LATENT_DIM = 8
HIDDEN = 64

IN_DIM = S_DIM * 2 + LATENT_DIM            # 16
OUT_DIM = S_DIM * 2 * OUTPUT_DIM           # 32
HALF = OUTPUT_DIM * S_DIM                  # 16  (flat width of theta / phi each)

PHI_MAX = math.pi / 2.0
PHI_SCALE = PHI_MAX - (-math.pi / 2.0)     # == pi


def _round_up(n, m):
    return ((n + m - 1) // m) * m


def _laplace_kernel(x_ref, w1_ref, b1_ref, w2_ref, b2_ref, w3_ref, b3_ref, out_ref):
    """Whole MLP + head non-linearities for one batch tile, feature-major in VMEM.

    x_ref:  (IN_DIM, TB)      w*: (out, in)      b*: (out, 1)
    out_ref:(OUT_DIM, TB)  rows [0, HALF) = theta (flat), rows [HALF, OUT_DIM) = phi.
    """
    x = x_ref[...]                                                       # (16, TB)
    h1 = jnp.tanh(
        jnp.dot(w1_ref[...], x, preferred_element_type=jnp.float32) + b1_ref[...])
    h2 = jnp.tanh(
        jnp.dot(w2_ref[...], h1, preferred_element_type=jnp.float32) + b2_ref[...])
    pre = (jnp.dot(w3_ref[...], h2, preferred_element_type=jnp.float32)
           + b3_ref[...])                                                # (32, TB)

    # Single full-width tanh on the whole 32-row head (one EUP stream, full vregs).
    t = jnp.tanh(pre)

    # Per-row affine: theta rows -> *pi, phi rows -> *PHI_SCALE/2 + (PHI_SCALE/2 - pi/2).
    row = jax.lax.broadcasted_iota(jnp.int32, (OUT_DIM, 1), 0)
    is_theta = row < HALF
    scale = jnp.where(is_theta, jnp.pi, PHI_SCALE * 0.5)
    offset = jnp.where(is_theta, 0.0, PHI_SCALE * 0.5 - jnp.pi * 0.5)
    out_ref[...] = t * scale + offset


def laplace_representation_func(x, params, *, batch_tile=1024):
    """x: (B, S_DIM*2 + LATENT_DIM) float32 -> (theta, phi), each (B, OUTPUT_DIM, S_DIM).

    params: (w1, b1, w2, b2, w3, b3) with weights in PyTorch-native [out, in] layout
    and biases of shape (out, 1).
    """
    w1, b1, w2, b2, w3, b3 = params
    B = x.shape[0]

    # --- choose a lane-aligned batch tile (multiple of 128) and pad the batch ---
    b128 = _round_up(B, 128)
    tile = min(batch_tile, b128)
    if b128 >= 2 * 128:
        # keep >= 2 grid steps when possible so v7x's two TensorCores both get work
        tile = min(tile, (b128 // 2 // 128) * 128)
    tile = max(128, (tile // 128) * 128)
    Bp = _round_up(B, tile)

    # lane-dense layout: batch on the 128-lane (last) axis; transpose/pad is JAX glue
    xt = x.T                                           # (IN_DIM, B)
    if Bp != B:
        xt = jnp.pad(xt, ((0, 0), (0, Bp - B)))

    grid = (Bp // tile,)
    const2d = lambda b: (0, 0)    # weights/biases: same full block every grid step
    batched = lambda b: (0, b)    # activations/output: tile over batch (lane axis)

    out_flat = pl.pallas_call(
        _laplace_kernel,
        out_shape=jax.ShapeDtypeStruct((OUT_DIM, Bp), jnp.float32),
        grid_spec=pltpu.PrefetchScalarGridSpec(
            num_scalar_prefetch=0,
            grid=grid,
            in_specs=[
                pl.BlockSpec((IN_DIM, tile), batched),     # x   (feature-major)
                pl.BlockSpec((HIDDEN, IN_DIM), const2d),   # w1  [out, in]
                pl.BlockSpec((HIDDEN, 1), const2d),        # b1
                pl.BlockSpec((HIDDEN, HIDDEN), const2d),   # w2
                pl.BlockSpec((HIDDEN, 1), const2d),        # b2
                pl.BlockSpec((OUT_DIM, HIDDEN), const2d),  # w3
                pl.BlockSpec((OUT_DIM, 1), const2d),       # b3
            ],
            out_specs=pl.BlockSpec((OUT_DIM, tile), batched),
        ),
        compiler_params=pltpu.CompilerParams(
            dimension_semantics=("parallel",)),
    )(xt, w1, b1, w2, b2, w3, b3)

    out = out_flat[:, :B].T                              # (B, OUT_DIM), drop padding
    theta = out[:, :HALF].reshape(B, OUTPUT_DIM, S_DIM)
    phi = out[:, HALF:].reshape(B, OUTPUT_DIM, S_DIM)
    return theta, phi


def init_params(key):
    """Deterministic xavier-uniform weights (as in the module) + uniform biases.

    Weights are stored PyTorch-native [out_features, in_features]; biases (out, 1).
    """
    def xavier(key, fan_out, fan_in):
        bound = math.sqrt(6.0 / (fan_in + fan_out))
        return jax.random.uniform(key, (fan_out, fan_in), jnp.float32, -bound, bound)

    def bias(key, fan_in, fan_out):
        # PyTorch nn.Linear default bias init: U(-1/sqrt(fan_in), 1/sqrt(fan_in))
        bound = 1.0 / math.sqrt(fan_in)
        return jax.random.uniform(key, (fan_out, 1), jnp.float32, -bound, bound)

    ks = jax.random.split(key, 6)
    w1 = xavier(ks[0], HIDDEN, IN_DIM)
    b1 = bias(ks[1], IN_DIM, HIDDEN)
    w2 = xavier(ks[2], HIDDEN, HIDDEN)
    b2 = bias(ks[3], HIDDEN, HIDDEN)
    w3 = xavier(ks[4], OUT_DIM, HIDDEN)
    b3 = bias(ks[5], HIDDEN, OUT_DIM)
    return (w1, b1, w2, b2, w3, b3)


def _reference(x, params):
    """Plain-JAX reference of the PyTorch forward, for a sanity check."""
    w1, b1, w2, b2, w3, b3 = params
    h = jnp.tanh(x @ w1.T + b1.T)
    h = jnp.tanh(h @ w2.T + b2.T)
    out = (h @ w3.T + b3.T).reshape(-1, 2 * OUTPUT_DIM, S_DIM)
    theta = jnp.tanh(out[:, :OUTPUT_DIM, :]) * jnp.pi
    phi = (jnp.tanh(out[:, OUTPUT_DIM:, :]) * PHI_SCALE / 2.0
           - jnp.pi / 2.0 + PHI_SCALE / 2.0)
    return theta, phi


if __name__ == "__main__":
    key = jax.random.PRNGKey(0)
    k_params, k_x1, k_x2 = jax.random.split(key, 3)

    params = init_params(k_params)

    # Small demo batch (padded internally to one 128-wide lane tile).
    B = 8
    x = jax.random.normal(k_x1, (B, IN_DIM), jnp.float32)
    theta, phi = laplace_representation_func(x, params)
    theta, phi = jax.block_until_ready((theta, phi))

    theta_ref, phi_ref = _reference(x, params)
    assert theta.shape == (B, OUTPUT_DIM, S_DIM) and phi.shape == (B, OUTPUT_DIM, S_DIM)
    assert jnp.allclose(theta, theta_ref, atol=1e-5, rtol=1e-5)
    assert jnp.allclose(phi, phi_ref, atol=1e-5, rtol=1e-5)

    # Non-multiple batch: exercises padding + multi-step grid (3 tiles of 128).
    B2 = 300
    x2 = jax.random.normal(k_x2, (B2, IN_DIM), jnp.float32)
    theta2, phi2 = laplace_representation_func(x2, params)
    theta2, phi2 = jax.block_until_ready((theta2, phi2))
    theta2_ref, phi2_ref = _reference(x2, params)
    assert theta2.shape == (B2, OUTPUT_DIM, S_DIM)
    assert jnp.allclose(theta2, theta2_ref, atol=1e-5, rtol=1e-5)
    assert jnp.allclose(phi2, phi2_ref, atol=1e-5, rtol=1e-5)

    print("KERNEL_OK")
</pallas_src>

<mosaic_0001>
module attributes {stable_mosaic.version = 11 : i64} {
  func.func @_laplace_kernel(%arg0: i32, %arg1: memref<16x128xf32, #tpu.memory_space<vmem>>, %arg2: memref<64x16xf32, #tpu.memory_space<vmem>>, %arg3: memref<64x1xf32, #tpu.memory_space<vmem>>, %arg4: memref<64x64xf32, #tpu.memory_space<vmem>>, %arg5: memref<64x1xf32, #tpu.memory_space<vmem>>, %arg6: memref<32x64xf32, #tpu.memory_space<vmem>>, %arg7: memref<32x1xf32, #tpu.memory_space<vmem>>, %arg8: memref<32x128xf32, #tpu.memory_space<vmem>>) attributes {dimension_semantics = [#tpu.dimension_semantics<parallel>], iteration_bounds = array<i64: 1>, scalar_prefetch = 0 : i64, scratch_operands = 0 : i64, tpu.core_type = #tpu.core_type<tc>, window_params = [{transform_indices = @transform_0, window_bounds = array<i64: 16, 128>}, {pipeline_mode = #tpu.pipeline_mode<synchronous>, transform_indices = @transform_1, window_bounds = array<i64: 64, 16>}, {pipeline_mode = #tpu.pipeline_mode<synchronous>, transform_indices = @transform_2, window_bounds = array<i64: 64, 1>}, {pipeline_mode = #tpu.pipeline_mode<synchronous>, transform_indices = @transform_3, window_bounds = array<i64: 64, 64>}, {pipeline_mode = #tpu.pipeline_mode<synchronous>, transform_indices = @transform_4, window_bounds = array<i64: 64, 1>}, {pipeline_mode = #tpu.pipeline_mode<synchronous>, transform_indices = @transform_5, window_bounds = array<i64: 32, 64>}, {pipeline_mode = #tpu.pipeline_mode<synchronous>, transform_indices = @transform_6, window_bounds = array<i64: 32, 1>}, {transform_indices = @transform_7, window_bounds = array<i64: 32, 128>}]} {
    %c0 = arith.constant 0 : index
    %c0_0 = arith.constant 0 : index
    %0 = vector.load %arg1[%c0, %c0_0] : memref<16x128xf32, #tpu.memory_space<vmem>>, vector<16x128xf32>
    %c0_1 = arith.constant 0 : index
    %c0_2 = arith.constant 0 : index
    %1 = vector.load %arg2[%c0_1, %c0_2] : memref<64x16xf32, #tpu.memory_space<vmem>>, vector<64x16xf32>
    %cst = arith.constant dense<0.000000e+00> : vector<64x128xf32>
    %2 = tpu.matmul %1, %0, %cst {dimension_numbers = #tpu.dot_dimension_numbers<[1], [0], [0], [1], [0, 0, 1, 1], [], []>} : vector<64x16xf32>, vector<16x128xf32>, vector<64x128xf32> -> vector<64x128xf32>
    %c0_3 = arith.constant 0 : index
    %c0_4 = arith.constant 0 : index
    %3 = vector.load %arg3[%c0_3, %c0_4] : memref<64x1xf32, #tpu.memory_space<vmem>>, vector<64x1xf32>
    %4 = vector.broadcast %3 : vector<64x1xf32> to vector<64x128xf32>
    %5 = arith.addf %2, %4 : vector<64x128xf32>
    %6 = math.tanh %5 : vector<64x128xf32>
    %c0_5 = arith.constant 0 : index
    %c0_6 = arith.constant 0 : index
    %7 = vector.load %arg4[%c0_5, %c0_6] : memref<64x64xf32, #tpu.memory_space<vmem>>, vector<64x64xf32>
    %cst_7 = arith.constant dense<0.000000e+00> : vector<64x128xf32>
    %8 = tpu.matmul %7, %6, %cst_7 {dimension_numbers = #tpu.dot_dimension_numbers<[1], [0], [0], [1], [0, 0, 1, 1], [], []>} : vector<64x64xf32>, vector<64x128xf32>, vector<64x128xf32> -> vector<64x128xf32>
    %c0_8 = arith.constant 0 : index
    %c0_9 = arith.constant 0 : index
    %9 = vector.load %arg5[%c0_8, %c0_9] : memref<64x1xf32, #tpu.memory_space<vmem>>, vector<64x1xf32>
    %10 = vector.broadcast %9 : vector<64x1xf32> to vector<64x128xf32>
    %11 = arith.addf %8, %10 : vector<64x128xf32>
    %12 = math.tanh %11 : vector<64x128xf32>
    %c0_10 = arith.constant 0 : index
    %c0_11 = arith.constant 0 : index
    %13 = vector.load %arg6[%c0_10, %c0_11] : memref<32x64xf32, #tpu.memory_space<vmem>>, vector<32x64xf32>
    %cst_12 = arith.constant dense<0.000000e+00> : vector<32x128xf32>
    %14 = tpu.matmul %13, %12, %cst_12 {dimension_numbers = #tpu.dot_dimension_numbers<[1], [0], [0], [1], [0, 0, 1, 1], [], []>} : vector<32x64xf32>, vector<64x128xf32>, vector<32x128xf32> -> vector<32x128xf32>
    %c0_13 = arith.constant 0 : index
    %c0_14 = arith.constant 0 : index
    %15 = vector.load %arg7[%c0_13, %c0_14] : memref<32x1xf32, #tpu.memory_space<vmem>>, vector<32x1xf32>
    %16 = vector.broadcast %15 : vector<32x1xf32> to vector<32x128xf32>
    %17 = arith.addf %14, %16 : vector<32x128xf32>
    %18 = math.tanh %17 : vector<32x128xf32>
    %19 = tpu.iota {dimensions = array<i32: 0>} : vector<32x1xi32>
    %c16_i32 = arith.constant 16 : i32
    %20 = vector.broadcast %c16_i32 : i32 to vector<32x1xi32>
    %21 = arith.cmpi slt, %19, %20 : vector<32x1xi32>
    %cst_15 = arith.constant 3.14159274 : f32
    %cst_16 = arith.constant 1.57079637 : f32
    %22 = vector.broadcast %cst_15 : f32 to vector<32x1xf32>
    %23 = vector.broadcast %cst_16 : f32 to vector<32x1xf32>
    %24 = arith.select %21, %22, %23 : vector<32x1xi1>, vector<32x1xf32>
    %cst_17 = arith.constant 0.000000e+00 : f32
    %cst_18 = arith.constant 0.000000e+00 : f32
    %25 = vector.broadcast %cst_17 : f32 to vector<32x1xf32>
    %26 = vector.broadcast %cst_18 : f32 to vector<32x1xf32>
    %27 = arith.select %21, %25, %26 : vector<32x1xi1>, vector<32x1xf32>
    %28 = vector.broadcast %24 : vector<32x1xf32> to vector<32x128xf32>
    %29 = arith.mulf %18, %28 : vector<32x128xf32>
    %30 = vector.broadcast %27 : vector<32x1xf32> to vector<32x128xf32>
    %31 = arith.addf %29, %30 : vector<32x128xf32>
    %c0_19 = arith.constant 0 : index
    %c0_20 = arith.constant 0 : index
    %32 = vector.load %arg8[%c0_19, %c0_20] : memref<32x128xf32, #tpu.memory_space<vmem>>, vector<32x128xf32>
    tpu.vector_store %arg8[%c0_19, %c0_20], %31 {strides = array<i32>} : memref<32x128xf32, #tpu.memory_space<vmem>>, vector<32x128xf32>,
    return
  }
  func.func @transform_0(%arg0: i32) -> (i32, i32) {
    %c0_i32 = arith.constant 0 : i32
    %c0_i32_0 = arith.constant 0 : i32
    return %c0_i32, %arg0 : i32, i32
  }
  func.func @transform_1(%arg0: i32) -> (i32, i32) {
    %c0_i32 = arith.constant 0 : i32
    %c0_i32_0 = arith.constant 0 : i32
    %c0_i32_1 = arith.constant 0 : i32
    return %c0_i32, %c0_i32_0 : i32, i32
  }
  func.func @transform_2(%arg0: i32) -> (i32, i32) {
    %c0_i32 = arith.constant 0 : i32
    %c0_i32_0 = arith.constant 0 : i32
    %c0_i32_1 = arith.constant 0 : i32
    return %c0_i32, %c0_i32_0 : i32, i32
  }
  func.func @transform_3(%arg0: i32) -> (i32, i32) {
    %c0_i32 = arith.constant 0 : i32
    %c0_i32_0 = arith.constant 0 : i32
    %c0_i32_1 = arith.constant 0 : i32
    return %c0_i32, %c0_i32_0 : i32, i32
  }
  func.func @transform_4(%arg0: i32) -> (i32, i32) {
    %c0_i32 = arith.constant 0 : i32
    %c0_i32_0 = arith.constant 0 : i32
    %c0_i32_1 = arith.constant 0 : i32
    return %c0_i32, %c0_i32_0 : i32, i32
  }
  func.func @transform_5(%arg0: i32) -> (i32, i32) {
    %c0_i32 = arith.constant 0 : i32
    %c0_i32_0 = arith.constant 0 : i32
    %c0_i32_1 = arith.constant 0 : i32
    return %c0_i32, %c0_i32_0 : i32, i32
  }
  func.func @transform_6(%arg0: i32) -> (i32, i32) {
    %c0_i32 = arith.constant 0 : i32
    %c0_i32_0 = arith.constant 0 : i32
    %c0_i32_1 = arith.constant 0 : i32
    return %c0_i32, %c0_i32_0 : i32, i32
  }
  func.func @transform_7(%arg0: i32) -> (i32, i32) {
    %c0_i32 = arith.constant 0 : i32
    %c0_i32_0 = arith.constant 0 : i32
    return %c0_i32, %arg0 : i32, i32
  }
}

</mosaic_0001>

<bundles_post_ra>
// kernel: tpu_custom_call.1
= control target key start
LH: loop header
LB: loop body
LE: loop exit
PB: predicated region body
PF: predicated region fallthrough
CT: control target
= control target key end

     0   :  { %vm85_vm0 = vcmask 130048   ;;  %v817_v4 = vmov 0   ;;  %s1019_s0 = inlined_call_operand.vmem [shape: f32[16,128], index: 0, kind: input, shape index: {}]   ;;  %s1020_s1 = inlined_call_operand.vmem [shape: f32[64,16], index: 1, kind: input, shape index: {}]   ;;  %s1021_s2 = inlined_call_operand.vmem [shape: f32[64,1], index: 2, kind: input, shape index: {}]   ;;  %s1022_s3 = inlined_call_operand.vmem [shape: f32[64,64], index: 3, kind: input, shape index: {}]   ;;  %s1023_s4 = inlined_call_operand.vmem [shape: f32[64,1], index: 4, kind: input, shape index: {}]   ;;  %s1024_s5 = inlined_call_operand.vmem [shape: f32[32,64], index: 5, kind: input, shape index: {}]   ;;  %s1025_s6 = inlined_call_operand.vmem [shape: f32[32,1], index: 6, kind: input, shape index: {}]   ;;  %s1026_s7 = inlined_call_operand.hbm [shape: f32[32,128], index: 7, kind: output, shape index: {}]  }
   0x1   :  { %v27_v0 = vld [vmem:[%s1019_s0] sm:$0xff]  ;;  %v28_v1 = vld [vmem:[%s1019_s0 + $0x8] sm:$0xff]  ;;  %751 = vset.pattern.permute.xlu0 %v817_v4  ;;  %752 = vset.pattern.permute.xlu1 %v817_v4  ;;  %v39_v6 = vld [vmem:[%s1021_s2 + $0x10] sm:$0xff] }
   0x2   :  { %v29_v2 = vld [vmem:[%s1020_s1] sm:$0xff]  ;;  %v711_v3 = vpack.c.bf16 %v28_v1, %v27_v0  ;;  %v30_v7 = vld [vmem:[%s1020_s1 + $0x8] sm:$0xff]  ;;  %v31_v8 = vld [vmem:[%s1020_s1 + $0x10] sm:$0xff]  ;;  %57 = vperm.xlu1 %752, %v39_v6  }
   0x3   :  { %649 = vmatprep.mubr.msk.f32.mxu0 %vm85_vm0, %v29_v2  ;;  %v37_v5 = vld [vmem:[%s1021_s2] sm:$0xff]  ;;  %v38_v9 = vld [vmem:[%s1021_s2 + $0x8] sm:$0xff]  ;;  %v40_v10 = vld [vmem:[%s1021_s2 + $0x18] sm:$0xff] }
   0x4   :  { %712 = vmatprep.subr.bf16.mxu0 %v711_v3  ;;  %47 = vperm.xlu0 %751, %v37_v5   ;;  %v32_v11 = vld [vmem:[%s1020_s1 + $0x18] sm:$0xff]  ;;  %v33_v12 = vld [vmem:[%s1020_s1 + $0x20] sm:$0xff]  ;;  %v42_v14 = vld [vmem:[%s1021_s2 + $0x28] sm:$0xff] }
   0x5   :  { %714 = vmatpush3.bf16.msra.mxu0 %v711_v3  ;;  %v41_v13 = vld [vmem:[%s1021_s2 + $0x20] sm:$0xff] }
   0x6   :  { %62 = vperm.xlu1 %752, %v40_v10  }
   0x8   :  { %650 = vmatmul.mubr.msk.f32.vlgmr.msra.gmra.mrb[0].mxu0 %vm85_vm0, %v30_v7  ;;  %52 = vperm.xlu0 %751, %v38_v9  }
   0x9   :  { %652 = vmatprep.mubr.msk.f32.mxu0 %vm85_vm0, %v31_v8 }
   0xa   :  { %12 = vsyncpa [#allocation3], 0  ;;  %v34_v15 = vld [vmem:[%s1020_s1 + $0x28] sm:$0xff]  ;;  %v35_v16 = vld [vmem:[%s1020_s1 + $0x30] sm:$0xff]  ;;  %72 = vperm.xlu1 %752, %v42_v14   ;;  %vm279_vm1 = vcmask 523264  }
   0xb   :  { %v43_v17 = vld [vmem:[%s1021_s2 + $0x30] sm:$0xff]  ;;  %v44_v18 = vld [vmem:[%s1021_s2 + $0x38] sm:$0xff]  ;;  %v231_v20 = vld [vmem:[%s1023_s4] sm:$0xff] }
   0xc   :  { %653 = vmatmul.mubr.msk.f32.gmra.mrb[2].mxu0 %vm85_vm0, %v32_v11  ;;  %67 = vperm.xlu0 %751, %v41_v13   ;;  %v36_v19 = vld [vmem:[%s1020_s1 + $0x38] sm:$0xff]  ;;  %v232_v21 = vld [vmem:[%s1023_s4 + $0x8] sm:$0xff]  ;;  %v233_v22 = vld [vmem:[%s1023_s4 + $0x10] sm:$0xff] }
   0xd   :  { %655 = vmatprep.mubr.msk.f32.mxu0 %vm85_vm0, %v33_v12  ;;  %v234_v23 = vld [vmem:[%s1023_s4 + $0x18] sm:$0xff]  ;;  %v235_v24 = vld [vmem:[%s1023_s4 + $0x20] sm:$0xff]  ;;  %v236_v25 = vld [vmem:[%s1023_s4 + $0x28] sm:$0xff] }
   0xe   :  { %82 = vperm.xlu1 %752, %v44_v18   ;;  %v237_v26 = vld [vmem:[%s1023_s4 + $0x30] sm:$0xff]  ;;  %v238_v27 = vld [vmem:[%s1023_s4 + $0x38] sm:$0xff]  ;;  %v421_v28 = vld [vmem:[%s1025_s6] sm:$0xff] }
   0xf   :  { %v422_v29 = vld [vmem:[%s1025_s6 + $0x8] sm:$0xff]  ;;  %v423_v30 = vld [vmem:[%s1025_s6 + $0x10] sm:$0xff]  ;;  %v424_v31 = vld [vmem:[%s1025_s6 + $0x18] sm:$0xff] }
  0x10   :  { %656 = vmatmul.mubr.msk.f32.gmra.mrb[4].mxu0 %vm85_vm0, %v34_v15  ;;  %77 = vperm.xlu0 %751, %v43_v17   ;;  %v223_v32 = vld [vmem:[%s1022_s3] sm:$0xff]  ;;  %v224_v5 = vld [vmem:[%s1022_s3 + $0x8] sm:$0xff]  ;;  %v225_v6 = vld [vmem:[%s1022_s3 + $0x10] sm:$0xff] }
  0x11   :  { %658 = vmatprep.mubr.msk.f32.mxu0 %vm85_vm0, %v35_v16  ;;  %677 = vmatprep.mubr.msk.f32.mxu1 %vm279_vm1, %v223_v32  ;;  %v226_v7 = vld [vmem:[%s1022_s3 + $0x18] sm:$0xff]  ;;  %v227_v8 = vld [vmem:[%s1022_s3 + $0x20] sm:$0xff]  ;;  %v228_v9 = vld [vmem:[%s1022_s3 + $0x28] sm:$0xff] }
  0x12   :  { %246 = vperm.xlu1 %752, %v232_v21   ;;  %v229_v10 = vld [vmem:[%s1022_s3 + $0x30] sm:$0xff]  ;;  %v230_v11 = vld [vmem:[%s1022_s3 + $0x38] sm:$0xff]  ;;  %v417_v12 = vld [vmem:[%s1024_s5] sm:$0xff] }
  0x14   :  { %659 = vmatmul.mubr.msk.f32.gmra.mrb[6].mxu0 %vm85_vm0, %v36_v19  ;;  %241 = vperm.xlu0 %751, %v231_v20  }
  0x15   :  { %705 = vmatprep.mubr.msk.f32.mxu0 %vm279_vm1, %v417_v12 }
  0x16   :  { %256 = vperm.xlu1 %752, %v234_v23  }
  0x18   :  { %251 = vperm.xlu0 %751, %v233_v22  }
  0x1a   :  { %266 = vperm.xlu1 %752, %v236_v25  }
  0x1c   :  { %261 = vperm.xlu0 %751, %v235_v24  }
  0x1e   :  { %276 = vperm.xlu1 %752, %v238_v27  }
  0x20   :  { %271 = vperm.xlu0 %751, %v237_v26  }
  0x22   :  { %432 = vperm.xlu1 %752, %v422_v29  }
  0x24   :  { %427 = vperm.xlu0 %751, %v421_v28  }
  0x26   :  { %442 = vperm.xlu1 %752, %v424_v31  }
  0x28   :  { %437 = vperm.xlu0 %751, %v423_v30  }
  0x81   :  { %v58_v34 = vpop.permute.xlu1 %57 }
  0x83   :  { %v48_v33 = vpop.permute.xlu0 %47 }
  0x85   :  { %v63_v36 = vpop.permute.xlu1 %62 }
  0x87   :  { %v53_v35 = vpop.permute.xlu0 %52 }
  0x89   :  { %v73_v44 = vpop.permute.xlu1 %72 }
  0x8b   :  { %v68_v46 = vpop.permute.xlu0 %67 }
  0x8d   :  { %v83_v51 = vpop.permute.xlu1 %82 }
  0x8f   :  { %v78_v54 = vpop.permute.xlu0 %77 }
  0x91   :  { %v247_v13 = vpop.permute.xlu1 %246 }
  0x93   :  { %v242_v14 = vpop.permute.xlu0 %241 }
  0x95   :  { %v257_v15 = vpop.permute.xlu1 %256 }
  0x97   :  { %v252_v17 = vpop.permute.xlu0 %251 }
  0x99   :  { %v267_v24 = vpop.permute.xlu1 %266 }
  0x9b   :  { %v262_v26 = vpop.permute.xlu0 %261 }
  0x9d   :  { %v277_v31 = vpop.permute.xlu1 %276 }
  0xdb   :  { %v651_v37 = vpop.f32.mrb[0].mxu0 }
  0xdc   :  { %v182_v38 = vadd.f32 %v651_v37, %v53_v35  ;;  %v176_v39 = vpop.f32.mrb[1].mxu0 }
  0xdd   :  { %v177_v40 = vadd.f32 %v176_v39, %v48_v33 }
  0xde   :  { %753 = vtanh.f32 %v182_v38 }
  0xdf   :  { %755 = vtanh.f32 %v177_v40  ;;  %v654_v41 = vpop.f32.mrb[2].mxu0 }
  0xe0   :  { %v192_v42 = vadd.f32 %v654_v41, %v63_v36  ;;  %v186_v43 = vpop.f32.mrb[3].mxu0 }
  0xe1   :  { %v187_v45 = vadd.f32 %v186_v43, %v58_v34  ;;  %v272_v34 = vpop.permute.xlu0 %271 }
  0xe2   :  { %757 = vtanh.f32 %v192_v42 }
  0xe3   :  { %759 = vtanh.f32 %v187_v45  ;;  %v657_v47 = vpop.f32.mrb[4].mxu0 }
  0xe4   :  { %v202_v48 = vadd.f32 %v657_v47, %v73_v44  ;;  %v196_v49 = vpop.f32.mrb[5].mxu0 }
  0xe5   :  { %v197_v50 = vadd.f32 %v196_v49, %v68_v46  ;;  %v418_v49 = vld [vmem:[%s1024_s5 + $0x8] sm:$0xff] }
  0xe6   :  { %761 = vtanh.f32 %v202_v48 }
  0xe7   :  { %763 = vtanh.f32 %v197_v50  ;;  %v660_v52 = vpop.f32.mrb[6].mxu0  ;;  %v419_v50 = vld [vmem:[%s1024_s5 + $0x10] sm:$0xff] }
  0xe8   :  { %v754_v53 = vpop.eup %753  ;;  %v212_v55 = vadd.f32 %v660_v52, %v83_v51  ;;  %v206_v56 = vpop.f32.mrb[7].mxu0  ;;  %v420_v51 = vld [vmem:[%s1024_s5 + $0x18] sm:$0xff]  ;;  %s818_s5 = smov [#allocation2]  }
  0xe9   :  { %v756_v57 = vpop.eup %755  ;;  %v207_v58 = vadd.f32 %v206_v56, %v78_v54  ;;  %v433_v52 = vpop.permute.xlu1 %432  ;;  %s576_s29 = sshll.u32 %s818_s5, 4  ;;  %s577_s29 = int_to_ptr.vmem [resolvable:$true] %s576_s29 }
  0xea   :  { %765 = vtanh.f32 %v212_v55  ;;  %v715_v59 = vpack.c.bf16 %v754_v53, %v756_v57  ;;  %v428_v53 = vpop.permute.xlu0 %427  ;;  %s793_s30 = scalar_lea.vmem %s577_s29, 512  ;;  %p798_p1 = scmp.lt.s32.totalorder %s577_s29, %s577_s29 }
  0xeb   :  { %767 = vtanh.f32 %v207_v58  ;;  %p794_p0 = scmp.ne.s32.totalorder %s577_s29, %s793_s30  ;;  %p799_p2 = scmp.lt.s32.totalorder %s793_s30, %s793_s30 }
  0xec   :  { %v758_v60 = vpop.eup %757  ;;  %716 = vmatprep.subr.bf16.mxu1 %v715_v59 }
  0xed   :  { %v760_v61 = vpop.eup %759  ;;  %718 = vmatpush3.bf16.msra.mxu1 %v715_v59  ;;  %v443_v58 = vpop.permute.xlu1 %442  ;;  %p800_p3 = por %p799_p2, %p798_p1 }
  0xee   :  { %v719_v62 = vpack.c.bf16 %v758_v60, %v760_v61  ;;  %v438_v60 = vpop.permute.xlu0 %437 }
  0xef   :  { %p801_p4 = pnand %p800_p3, %p794_p0 }
  0xf0   :  { %v762_v63 = vpop.eup %761  ;;  %720 = vmatprep.subr.bf16.mxu1 %v719_v62 }
  0xf1   :  { %v764_v0 = vpop.eup %763  ;;  %722 = vmatpush3.bf16.msra.mxu1 %v719_v62 }
  0xf2   :  { %v723_v1 = vpack.c.bf16 %v762_v63, %v764_v0 }
  0xf4   :  { %v766_v2 = vpop.eup %765  ;;  %724 = vmatprep.subr.bf16.mxu1 %v723_v1 }
  0xf5   :  { %v768_v3 = vpop.eup %767  ;;  %726 = vmatpush3.bf16.msra.mxu1 %v723_v1 }
  0xf6   :  { %v727_v4 = vpack.c.bf16 %v766_v2, %v768_v3 }
  0xf8   :  { %728 = vmatprep.subr.bf16.mxu1 %v727_v4 }
  0xf9   :  { %730 = vmatpush3.bf16.msra.mxu1 %v727_v4 }
  0xfc   :  { %678 = vmatmul.mubr.msk.f32.vlgmr.msra.gmra.mrb[0].mxu1 %vm279_vm1, %v224_v5 }
  0xfd   :  { %680 = vmatprep.mubr.msk.f32.mxu1 %vm279_vm1, %v225_v6 }
 0x100   :  { %681 = vmatmul.mubr.msk.f32.gmra.mrb[2].mxu1 %vm279_vm1, %v226_v7 }
 0x101   :  { %683 = vmatprep.mubr.msk.f32.mxu1 %vm279_vm1, %v227_v8 }
 0x104   :  { %684 = vmatmul.mubr.msk.f32.gmra.mrb[4].mxu1 %vm279_vm1, %v228_v9 }
 0x105   :  { %686 = vmatprep.mubr.msk.f32.mxu1 %vm279_vm1, %v229_v10 }
 0x108   :  { %687 = vmatmul.mubr.msk.f32.gmra.mrb[6].mxu1 %vm279_vm1, %v230_v11 }
 0x1cf   :  { %v679_v16 = vpop.f32.mrb[0].mxu1 }
 0x1d0   :  { %v376_v18 = vadd.f32 %v679_v16, %v247_v13  ;;  %v370_v19 = vpop.f32.mrb[1].mxu1 }
 0x1d1   :  { %v371_v20 = vadd.f32 %v370_v19, %v242_v14 }
 0x1d2   :  { %769 = vtanh.f32 %v376_v18 }
 0x1d3   :  { %771 = vtanh.f32 %v371_v20  ;;  %v682_v21 = vpop.f32.mrb[2].mxu1 }
 0x1d4   :  { %v386_v22 = vadd.f32 %v682_v21, %v257_v15  ;;  %v380_v23 = vpop.f32.mrb[3].mxu1 }
 0x1d5   :  { %v381_v25 = vadd.f32 %v380_v23, %v252_v17 }
 0x1d6   :  { %773 = vtanh.f32 %v386_v22 }
 0x1d7   :  { %775 = vtanh.f32 %v381_v25  ;;  %v685_v27 = vpop.f32.mrb[4].mxu1 }
 0x1d8   :  { %v396_v28 = vadd.f32 %v685_v27, %v267_v24  ;;  %v390_v29 = vpop.f32.mrb[5].mxu1 }
 0x1d9   :  { %v391_v30 = vadd.f32 %v390_v29, %v262_v26 }
 0x1da   :  { %777 = vtanh.f32 %v396_v28 }
 0x1db   :  { %779 = vtanh.f32 %v391_v30  ;;  %v688_v32 = vpop.f32.mrb[6].mxu1 }
 0x1dc   :  { %v770_v33 = vpop.eup %769  ;;  %v406_v35 = vadd.f32 %v688_v32, %v277_v31  ;;  %v400_v36 = vpop.f32.mrb[7].mxu1 }
 0x1dd   :  { %v772_v37 = vpop.eup %771  ;;  %v401_v38 = vadd.f32 %v400_v36, %v272_v34 }
 0x1de   :  { %781 = vtanh.f32 %v406_v35  ;;  %v731_v39 = vpack.c.bf16 %v770_v33, %v772_v37 }
 0x1df   :  { %783 = vtanh.f32 %v401_v38 }
 0x1e0   :  { %v774_v40 = vpop.eup %773  ;;  %732 = vmatprep.subr.bf16.mxu0 %v731_v39 }
 0x1e1   :  { %v776_v41 = vpop.eup %775  ;;  %734 = vmatpush3.bf16.msra.mxu0 %v731_v39 }
 0x1e2   :  { %v735_v42 = vpack.c.bf16 %v774_v40, %v776_v41 }
 0x1e4   :  { %v778_v43 = vpop.eup %777  ;;  %736 = vmatprep.subr.bf16.mxu0 %v735_v42 }
 0x1e5   :  { %v780_v44 = vpop.eup %779  ;;  %738 = vmatpush3.bf16.msra.mxu0 %v735_v42 }
 0x1e6   :  { %v739_v45 = vpack.c.bf16 %v778_v43, %v780_v44 }
 0x1e8   :  { %v782_v46 = vpop.eup %781  ;;  %740 = vmatprep.subr.bf16.mxu0 %v739_v45 }
 0x1e9   :  { %v784_v47 = vpop.eup %783  ;;  %742 = vmatpush3.bf16.msra.mxu0 %v739_v45 }
 0x1ea   :  { %v743_v48 = vpack.c.bf16 %v782_v46, %v784_v47 }
 0x1ec   :  { %744 = vmatprep.subr.bf16.mxu0 %v743_v48 }
 0x1ed   :  { %746 = vmatpush3.bf16.msra.mxu0 %v743_v48 }
 0x1f0   :  { %706 = vmatmul.mubr.msk.f32.vlgmr.msra.gmra.mrb[8].mxu0 %vm279_vm1, %v418_v49 }
 0x1f1   :  { %708 = vmatprep.mubr.msk.f32.mxu0 %vm279_vm1, %v419_v50 }
 0x1f4   :  { %709 = vmatmul.mubr.msk.f32.gmra.mrb[10].mxu0 %vm279_vm1, %v420_v51 }
 0x2c3   :  { %v707_v54 = vpop.f32.mrb[8].mxu0 }
 0x2c4   :  { %v529_v55 = vadd.f32 %v707_v54, %v433_v52  ;;  %v523_v56 = vpop.f32.mrb[9].mxu0 }
 0x2c5   :  { %v524_v57 = vadd.f32 %v523_v56, %v428_v53 }
 0x2c6   :  { %785 = vtanh.f32 %v529_v55 }
 0x2c7   :  { %787 = vtanh.f32 %v524_v57  ;;  %v710_v59 = vpop.f32.mrb[10].mxu0 }
 0x2c8   :  { %v539_v61 = vadd.f32 %v710_v59, %v443_v58  ;;  %v533_v62 = vpop.f32.mrb[11].mxu0 }
 0x2c9   :  { %v534_v63 = vadd.f32 %v533_v62, %v438_v60 }
 0x2ca   :  { %789 = vtanh.f32 %v539_v61 }
 0x2cb   :  { %791 = vtanh.f32 %v534_v63 }
 0x2d0   :  { %v786_v0 = vpop.eup %785 }
 0x2d1   :  { %v788_v1 = vpop.eup %787  ;;  %v560_v2 = vmul.f32 3.1415927, %v786_v0 }
 0x2d2   :  { %v559_v3 = vmul.f32 3.1415927, %v788_v1 }
 0x2d3   :  { %568 = vst [vmem:[#allocation2 + $0x8] sm:$0xff] %v560_v2 }
 0x2d4   :  { %v790_v4 = vpop.eup %789  ;;  %567 = vst [vmem:[#allocation2] sm:$0xff] %v559_v3 }
 0x2d5   :  { %v792_v5 = vpop.eup %791  ;;  %v562_v6 = vmul.f32 1.5707964, %v790_v4 }
 0x2d6   :  { %v561_v7 = vmul.f32 1.5707964, %v792_v5 }
 0x2d7   :  { %570 = vst [vmem:[#allocation2 + $0x18] sm:$0xff] %v562_v6 }
 0x2d8   :  { %569 = vst [vmem:[#allocation2 + $0x10] sm:$0xff] %v561_v7 }
 0x2d9   :  { %804 = shalt.err (!%p801_p4)
}
 0x2da   :  { %s805_s10 = scalar_lea.hbm %s1026_s7, 512 }
 0x2db   :  { %p806_p5 = scmp.ne.s32.totalorder %s1026_s7, %s805_s10  ;;  %p809_p6 = scmp.lt.u32.totalorder %s805_s10, %s1026_s7 }
 0x2dd   :  { %p811_p7 = pnand %p809_p6, %p806_p5 }
 0x2df   :  { %814 = shalt.err (!%p811_p7)
}
 0x2e0   :  { %s819_s12 = smov 128   ;;  %s820_s13 = smov 8  }
 0x2e1   :  { %582 = dma.vmem_to_hbm [thread:$0]  %s577_s29, 512, %s1026_s7, [#allocation3], %s819_s12, %s819_s12, %s820_s13  }
 0x2e2   :  { %815 = dma.done.wait [#allocation3], 512  }
 0x2e3   :  { %816 = vsyncadd [#allocation3], 4294966784 }
 0x2e4   :  { %586 = vsyncpa [#allocation3], 1 }

</bundles_post_ra>
